<compile_context>
chip_gen: v6e
topology: v6e:2x2x1
jax: 0.10.0
libtpu: 0.0.40
codegen_flags: <defaults>
</compile_context>

<pallas_src>
import jax
import jax.numpy as jnp
import numpy as np
from jax.experimental import pallas as pl
from jax.experimental.pallas import tpu as pltpu

_LANE = 128


def _scse_kernel(x_ref, wcs_ref, bcs_ref, sp_ref, o_ref):
    """One (batch, spatial-tile) block per grid step.

    x_ref  : (1, C, T_HW)  input tile (input dtype)
    wcs_ref: (C, 1)        channel-gate 1x1 conv weight (f32, VMEM)
    bcs_ref: (1,)          channel-gate bias (f32, SMEM scalar)
    sp_ref : (1, C, 1)     precomputed spatial gate, already sigmoid'd (f32)
    o_ref  : (1, C, T_HW)  output tile (input dtype)
    """
    x = x_ref[0].astype(jnp.float32)  # (C, T_HW)

    # Channel gate: sigmoid(w_cs . x + b) per pixel.  VPU multiply + sublane
    # reduce over C -- the MXU is never touched.
    # TODO(synk): on v7x, if a bundle dump shows VALU as the binding slot,
    # replace this with jnp.dot((1,C),(C,T_HW)) to offload onto the idle MXU.
    ch_logit = jnp.sum(x * wcs_ref[...], axis=0, keepdims=True) + bcs_ref[0]  # (1, T_HW)
    ch_gate = jax.nn.sigmoid(ch_logit)                                        # (1, T_HW)

    # Fused gate application: x*ch + x*sp == x*(ch + sp).
    gate = ch_gate + sp_ref[0]               # (1,T_HW) + (C,1) -> (C, T_HW)
    o_ref[0] = (x * gate).astype(o_ref.dtype)


def _budgets():
    """Per-tile byte budget and scoped-VMEM limit, gated on chip generation."""
    try:
        vmem_cap = pltpu.get_tpu_info().vmem_capacity_bytes
    except Exception:
        vmem_cap = None
    if vmem_cap is None:
        # Conservative default: works on every generation, ~85% of HBM roofline.
        return 2 * 1024 * 1024, 32 * 1024 * 1024
    if vmem_cap <= 64 * 1024 * 1024:
        # v7x-class: 64 MiB VMEM per TensorCore -> keep headroom for 4x tile
        # (double-buffered in + out).
        return 3 * 1024 * 1024, 40 * 1024 * 1024
    # v5e/v6e-class: 128 MiB physical VMEM -> larger tiles amortize the
    # ~0.35 us/step overhead.
    return 5 * 1024 * 1024, 48 * 1024 * 1024


@jax.jit
def channel_spatial_gate2d(x_nchw, w_cs, b_cs, w1, b1, w2, b2):
    """x_nchw: (B, C, H, W). Returns (B, C, H, W) in the input dtype."""
    B, C, H, W = x_nchw.shape
    HW = H * W
    Cr = w1.shape[0]
    dtype_bytes = jnp.dtype(x_nchw.dtype).itemsize

    x3 = x_nchw.reshape(B, C, HW)

    # ---- SpatialGate hoisted to plain JAX (tiny; needs the full-HW mean) ----
    m = jnp.mean(x3, axis=-1, dtype=jnp.float32)                         # (B, C)
    w1f = w1.reshape(Cr, C).astype(jnp.float32)
    w2f = w2.reshape(C, Cr).astype(jnp.float32)
    z1 = jax.nn.relu(m @ w1f.T + b1.reshape(1, Cr).astype(jnp.float32))  # (B, Cr)
    z2 = z1 @ w2f.T + b2.reshape(1, C).astype(jnp.float32)               # (B, C)
    sp_gate = jax.nn.sigmoid(z2).reshape(B, C, 1)                        # (B, C, 1)

    # ---- Spatial tiling: byte-budget-capped, lane dim a multiple of 128 ----
    budget_bytes, vmem_limit = _budgets()
    lanes_budget = max(_LANE, budget_bytes // max(1, C * dtype_bytes))
    hw_lanes = pl.cdiv(HW, _LANE) * _LANE
    t_hw = max(_LANE, (min(lanes_budget, hw_lanes) // _LANE) * _LANE)
    # v7x has 2 TensorCores: make sure the grid has >= 2 steps when possible so
    # the ("parallel","parallel") semantics can actually shard the work.
    while B * pl.cdiv(HW, t_hw) < 2 and t_hw > _LANE:
        t_hw = max(_LANE, ((t_hw // 2) // _LANE) * _LANE)
    n_hw = pl.cdiv(HW, t_hw)

    wcs_col = w_cs.reshape(C, 1).astype(jnp.float32)
    bcs_smem = b_cs.reshape(1).astype(jnp.float32)

    # No jnp.pad / no trailing slice: Pallas masks the partial trailing block.
    # Safe because the kernel never reduces over the HW axis.
    # TODO(synk): for C < 8, packing several batch rows per block would refill
    # under-occupied sublanes; only worth it if VALU ever becomes the limiter.
    out = pl.pallas_call(
        _scse_kernel,
        out_shape=jax.ShapeDtypeStruct((B, C, HW), x_nchw.dtype),
        grid_spec=pltpu.PrefetchScalarGridSpec(
            num_scalar_prefetch=0,
            grid=(B, n_hw),
            in_specs=[
                pl.BlockSpec((1, C, t_hw), lambda b, h: (b, 0, h)),       # x
                pl.BlockSpec((C, 1), lambda b, h: (0, 0)),                # w_cs
                pl.BlockSpec(memory_space=pltpu.MemorySpace.SMEM),        # b_cs
                pl.BlockSpec((1, C, 1), lambda b, h: (b, 0, 0)),          # sp_gate
            ],
            out_specs=pl.BlockSpec((1, C, t_hw), lambda b, h: (b, 0, h)),
        ),
        compiler_params=pltpu.CompilerParams(
            dimension_semantics=("parallel", "parallel"),
            vmem_limit_bytes=vmem_limit,
        ),
    )(x3, wcs_col, bcs_smem, sp_gate)

    return out.reshape(B, C, H, W)


def _reference(x, w_cs, b_cs, w1, b1, w2, b2):
    """Pure-JAX reference matching the PyTorch forward (NCHW)."""
    # ChannelGate2d
    ch = jnp.einsum("bchw,c->bhw", x, w_cs.reshape(-1)) + b_cs.reshape(())
    ch = jax.nn.sigmoid(ch)[:, None, :, :]
    out_ch = x * ch
    # SpatialGate2d
    m = jnp.mean(x, axis=(2, 3))                                  # (B, C)
    z1 = jax.nn.relu(m @ w1.reshape(w1.shape[0], -1).T + b1)      # (B, Cr)
    z2 = z1 @ w2.reshape(w2.shape[0], -1).T + b2                  # (B, C)
    sp = jax.nn.sigmoid(z2)[:, :, None, None]
    return out_ch + x * sp


if __name__ == "__main__":
    B, C, H, W = 2, 4, 16, 16
    Cr = C // 2  # reduction=2

    key = jax.random.PRNGKey(0)
    kx, k1, k2, k3, k4, k5, k6 = jax.random.split(key, 7)

    x = jax.random.normal(kx, (B, C, H, W), dtype=jnp.float32)

    # Deterministic parameter init (PyTorch Conv2d-like uniform bounds).
    def uinit(k, shape, fan_in):
        bound = 1.0 / np.sqrt(fan_in)
        return jax.random.uniform(k, shape, jnp.float32, -bound, bound)

    # ChannelGate2d.squeeze: Conv2d(C, 1, 1)
    w_cs = uinit(k1, (1, C, 1, 1), C)
    b_cs = uinit(k2, (1,), C)
    # SpatialGate2d.squeeze: Conv2d(C, C//2, 1)
    w1 = uinit(k3, (Cr, C, 1, 1), C)
    b1 = uinit(k4, (Cr,), C)
    # SpatialGate2d.expand: Conv2d(C//2, C, 1)
    w2 = uinit(k5, (C, Cr, 1, 1), Cr)
    b2 = uinit(k6, (C,), Cr)

    out = channel_spatial_gate2d(x, w_cs, b_cs, w1, b1, w2, b2)
    out = jax.block_until_ready(out)

    ref = _reference(x, w_cs, b_cs, w1, b1, w2, b2)
    np.testing.assert_allclose(np.asarray(out), np.asarray(ref),
                               rtol=1e-5, atol=1e-5)

    print("KERNEL_OK")
</pallas_src>

<mosaic_0001>
module attributes {stable_mosaic.version = 11 : i64} {
  func.func @_scse_kernel(%arg0: i32, %arg1: i32, %arg2: memref<1x4x256xf32, #tpu.memory_space<vmem>>, %arg3: memref<4x1xf32, #tpu.memory_space<vmem>>, %arg4: memref<1xf32, #tpu.memory_space<smem>>, %arg5: memref<1x4x1xf32, #tpu.memory_space<vmem>>, %arg6: memref<1x4x256xf32, #tpu.memory_space<vmem>>) attributes {dimension_semantics = [#tpu.dimension_semantics<parallel>, #tpu.dimension_semantics<parallel>], iteration_bounds = array<i64: 2, 1>, scalar_prefetch = 0 : i64, scratch_operands = 0 : i64, tpu.core_type = #tpu.core_type<tc>, window_params = [{transform_indices = @transform_0, window_bounds = array<i64: 1, 4, 256>}, {pipeline_mode = #tpu.pipeline_mode<synchronous>, transform_indices = @transform_1, window_bounds = array<i64: 4, 1>}, {transform_indices = @transform_2, window_bounds = array<i64: 1>}, {transform_indices = @transform_3, window_bounds = array<i64: 1, 4, 1>}, {transform_indices = @transform_4, window_bounds = array<i64: 1, 4, 256>}]} {
    %c0 = arith.constant 0 : index
    %c0_0 = arith.constant 0 : index
    %c0_1 = arith.constant 0 : index
    %0 = vector.load %arg2[%c0, %c0_0, %c0_1] : memref<1x4x256xf32, #tpu.memory_space<vmem>>, vector<1x4x256xf32>
    %1 = vector.shape_cast %0 : vector<1x4x256xf32> to vector<4x256xf32>
    %c0_2 = arith.constant 0 : index
    %c0_3 = arith.constant 0 : index
    %2 = vector.load %arg3[%c0_2, %c0_3] : memref<4x1xf32, #tpu.memory_space<vmem>>, vector<4x1xf32>
    %3 = vector.broadcast %2 : vector<4x1xf32> to vector<4x256xf32>
    %4 = arith.mulf %1, %3 : vector<4x256xf32>
    %cst = arith.constant dense<0.000000e+00> : vector<256xf32>
    %5 = vector.multi_reduction <add>, %4, %cst [0] : vector<4x256xf32> to vector<256xf32>
    %6 = vector.shape_cast %5 : vector<256xf32> to vector<1x256xf32>
    %c0_4 = arith.constant 0 : index
    %7 = memref.load %arg4[%c0_4] : memref<1xf32, #tpu.memory_space<smem>>
    %8 = vector.broadcast %7 : f32 to vector<1x256xf32>
    %9 = arith.addf %6, %8 : vector<1x256xf32>
    %10 = arith.negf %9 : vector<1x256xf32>
    %11 = math.exp %10 : vector<1x256xf32>
    %cst_5 = arith.constant 1.000000e+00 : f32
    %12 = vector.broadcast %cst_5 : f32 to vector<1x256xf32>
    %13 = arith.addf %12, %11 : vector<1x256xf32>
    %14 = arith.divf %12, %13 : vector<1x256xf32>
    %c0_6 = arith.constant 0 : index
    %c0_7 = arith.constant 0 : index
    %c0_8 = arith.constant 0 : index
    %15 = vector.load %arg5[%c0_6, %c0_7, %c0_8] : memref<1x4x1xf32, #tpu.memory_space<vmem>>, vector<1x4x1xf32>
    %16 = vector.shape_cast %15 : vector<1x4x1xf32> to vector<4x1xf32>
    %17 = vector.broadcast %14 : vector<1x256xf32> to vector<4x256xf32>
    %18 = vector.broadcast %16 : vector<4x1xf32> to vector<4x256xf32>
    %19 = arith.addf %17, %18 : vector<4x256xf32>
    %20 = arith.mulf %1, %19 : vector<4x256xf32>
    %c0_9 = arith.constant 0 : index
    %c0_10 = arith.constant 0 : index
    %c0_11 = arith.constant 0 : index
    %21 = vector.load %arg6[%c0_9, %c0_10, %c0_11] : memref<1x4x256xf32, #tpu.memory_space<vmem>>, vector<1x4x256xf32>
    %22 = vector.shape_cast %21 : vector<1x4x256xf32> to vector<4x256xf32>
    %23 = vector.shape_cast %20 : vector<4x256xf32> to vector<1x4x256xf32>
    tpu.vector_store %arg6[%c0_9, %c0_10, %c0_11], %23 {strides = array<i32>} : memref<1x4x256xf32, #tpu.memory_space<vmem>>, vector<1x4x256xf32>,
    return
  }
  func.func @transform_0(%arg0: i32, %arg1: i32) -> (i32, i32, i32) {
    %c0_i32 = arith.constant 0 : i32
    %c0_i32_0 = arith.constant 0 : i32
    return %arg0, %c0_i32, %arg1 : i32, i32, i32
  }
  func.func @transform_1(%arg0: i32, %arg1: i32) -> (i32, i32) {
    %c0_i32 = arith.constant 0 : i32
    %c0_i32_0 = arith.constant 0 : i32
    %c0_i32_1 = arith.constant 0 : i32
    return %c0_i32, %c0_i32_0 : i32, i32
  }
  func.func @transform_2(%arg0: i32, %arg1: i32) -> i32 {
    %c0_i32 = arith.constant 0 : i32
    %c0_i32_0 = arith.constant 0 : i32
    return %c0_i32 : i32
  }
  func.func @transform_3(%arg0: i32, %arg1: i32) -> (i32, i32, i32) {
    %c0_i32 = arith.constant 0 : i32
    %c0_i32_0 = arith.constant 0 : i32
    %c0_i32_1 = arith.constant 0 : i32
    return %arg0, %c0_i32, %c0_i32_0 : i32, i32, i32
  }
  func.func @transform_4(%arg0: i32, %arg1: i32) -> (i32, i32, i32) {
    %c0_i32 = arith.constant 0 : i32
    %c0_i32_0 = arith.constant 0 : i32
    return %arg0, %c0_i32, %arg1 : i32, i32, i32
  }
}

</mosaic_0001>

<bundles_post_ra>
// kernel: channel_spatial_gate2d.1
= control target key start
LH: loop header
LB: loop body
LE: loop exit
PB: predicated region body
PF: predicated region fallthrough
CT: control target
= control target key end

     0   :  { %s522_s17 = smov 0   ;;  %s524_s18 = smov 0   ;;  %s569_s0 = inlined_call_operand.vmem [shape: f32[2,4,256], index: 0, kind: input, shape index: {}]   ;;  %s570_s1 = inlined_call_operand.vmem [shape: f32[4,1], index: 1, kind: input, shape index: {}]   ;;  %s571_s2 = inlined_call_operand.<no memory space> [shape: f32[1], index: 2, kind: input, shape index: {}]   ;;  %s572_s3 = inlined_call_operand.vmem [shape: f32[2,4,1], index: 3, kind: input, shape index: {}]   ;;  %s573_s4 = inlined_call_operand.vmem [shape: f32[2,4,256], index: 4, kind: output, shape index: {}]  }
   0x1   :  { %9 = sst [smem:[#allocation2]] %s571_s2  ;;  %s526_s19 = smov 0  }
   0x2 LB: > { %s27_s2 = sadd.s32 1, %s486_s18  ;;  %p421_p0 = scmp.ge.s32.totalorder %s490_s19, 1  ;;  %s490_s19 = sphi %s526_s19, %s15_s19   ;;  %s486_s18 = sphi %s524_s18, %s575_s18   ;;  %s482_s17 = sphi %s522_s17, %s574_s17  }
   0x3   : > { %p29_p1 = scmp.ge.s32.totalorder %s27_s2, 2  ;;  %p193_p2 = scmp.lt.s32.totalorder %s490_s19, 3 }
   0x5   : > { %s577_s2 = smov (%p29_p1, %s27_s2), 0  ;;  %p194_p3 = pnand %p421_p0, %p193_p2 }
   0x6   : > { %p232_p4 = scmp.lt.s32.totalorder (!%p194_p3), %s482_s17, 1  ;;  %s288_s30 = sld [smem:[#allocation2]] (!%p194_p3) }
   0x7   : > { %197 = sbr.rel (%p194_p3) target bundleno = 198 (0xc6), region = 36 }
   0xc   : > { %v256_v0 = vld [vmem:[%s570_s1] sm:$0xf]  ;;  %v492_v1 = vmov 0   ;;  %s579_s17 = smov (!%p232_p4, %s482_s17), 1  ;;  %v493_v3 = vmov 839922192   ;;  %v264_v5 = vlaneseq  ;;  %v289_v25 = vstv %s288_s30 }
   0xd   : > { %459 = vset.pattern.permute.xlu0 %v492_v1  ;;  %s424_s22 = sshll.u32 %s579_s17, 2  ;;  %v262_v4 = vunpack.c.l.s4 %v493_v3  ;;  %s431_s26 = sshll.u32 %s579_s17, 3  ;;  %vm273_vm0 = vcmask 1043456  }
   0xe   : > { %259 = vperm.xlu0 %459, %v256_v0   ;;  %s244_s25 = scalar_lea.vmem %s572_s3, %s424_s22  ;;  %v265_v7 = vshrl.u32 %v264_v5, 7  ;;  %s239_s29 = scalar_lea.vmem %s569_s0, %s431_s26 }
   0xf   : > { %v304_v2 = vld [vmem:[%s244_s25] sm:$0xf]  ;;  %v263_v6 = vunpack.c.0.s8 %v262_v4  ;;  %s253_s7 = scalar_lea.vmem %s573_s4, %s431_s26 }
  0x10   : > { %v255_v10 = vld [vmem:[%s239_s29] sm:$0xff] }
  0x11   : > { %v266_v8 = vsub.s32 %v263_v6, %v265_v7 }
  0x12   : > { %307 = vperm.xlu0 %459, %v304_v2  }
  0x89   : > { %v260_v9 = vpop.permute.xlu0 %259 }
  0x8a   : > { %v267_v11 = vrot.slane %v260_v9, %v266_v8 }
  0x8c   : > { %v269_v12 = vmul.f32 %v267_v11, %v255_v10 }
  0x8d   : > { %v308_v39 = vpop.permute.xlu0 %307 }
  0x8e   : > { %v271_v13 = vcombine.high %v269_v12, %v269_v12  ;;  %v274_v14 = vsel %vm273_vm0, %v269_v12, 0.0 }
  0x8f   : > { %v275_v15 = vrot.slane %v274_v14, 4 }
  0x90   : > { %v281_v16 = vsel %vm273_vm0, %v271_v13, 0.0 }
  0x91   : > { %v276_v17 = vadd.f32 %v275_v15, %v274_v14  ;;  %v282_v18 = vrot.slane %v281_v16, 4 }
  0x93   : > { %v277_v19 = vrot.slane %v276_v17, 2  ;;  %v283_v20 = vadd.f32 %v282_v18, %v281_v16 }
  0x95   : > { %v278_v21 = vadd.f32 %v277_v19, %v276_v17  ;;  %v284_v22 = vrot.slane %v283_v20, 2 }
  0x97   : > { %v279_v23 = vrot.slane %v278_v21, 1  ;;  %v285_v24 = vadd.f32 %v284_v22, %v283_v20 }
  0x99   : > { %v280_v26 = vadd.f32 %v279_v23, %v278_v21  ;;  %v286_v27 = vrot.slane %v285_v24, 1 }
  0x9b   : > { %v287_v28 = vadd.f32 %v286_v27, %v285_v24  ;;  %v290_v29 = vadd.f32 %v289_v25, %v280_v26 }
  0x9d   : > { %v291_v30 = vadd.f32 %v289_v25, %v287_v28  ;;  %v427_v31 = vmul.f32 -1.442695, %v290_v29 }
  0x9f   : > { %460 = vpow2.f32 %v427_v31  ;;  %v428_v32 = vmul.f32 -1.442695, %v291_v30 }
  0xa1   : > { %462 = vpow2.f32 %v428_v32 }
  0xac   : > { %v461_v33 = vpop.eup %460 }
  0xad   : > { %v298_v34 = vadd.f32 1.0, %v461_v33 }
  0xae   : > { %v463_v35 = vpop.eup %462 }
  0xaf   : > { %v299_v36 = vadd.f32 1.0, %v463_v35  ;;  %464 = vrcp.f32 %v298_v34 }
  0xb1   : > { %466 = vrcp.f32 %v299_v36 }
  0xbc   : > { %v465_v37 = vpop.eup %464 }
  0xbd   : > { %v310_v40 = vadd.f32 %v465_v37, %v308_v39 }
  0xbe   : > { %v467_v38 = vpop.eup %466 }
  0xbf   : > { %v311_v41 = vadd.f32 %v467_v38, %v308_v39 }
  0xc1   : > { %v314_v42 = vcombine.low %v310_v40, %v311_v41 }
  0xc3   : > { %v316_v43 = vmul.f32 %v314_v42, %v255_v10 }
  0xc5   : > { %317 = vst [vmem:[%s253_s7] sm:$0xff] %v316_v43 }
  0xc6 PF: > { %s15_s19 = sadd.s32 1, %s490_s19   ;;  %s574_s17 = smov %s486_s18 }
  0xc7   : > { %p12_p5 = scmp.ge.s32.totalorder %s15_s19, 4   ;;  %s575_s18 = smov %s577_s2 }
  0xc9   :  { %14 = sbr.rel (!%p12_p5) target bundleno = 2 (0x2), region = 69 }

</bundles_post_ra>
